<compile_context>
chip_gen: v7x
topology: tpu7x:2x2x1
jax: 0.10.0
libtpu: 0.0.40
codegen_flags: <defaults>
</compile_context>

<pallas_src>
import functools

import jax
import jax.numpy as jnp
from jax.experimental import pallas as pl
from jax.experimental.pallas import tpu as pltpu


# ----------------------------- helpers --------------------------------------

def _round_up(x, m):
    return ((x + m - 1) // m) * m


def _pad2(x, rows, cols):
    r, c = x.shape
    return jnp.pad(x, ((0, rows - r), (0, cols - c)))


@functools.lru_cache(maxsize=None)
def _vmem_limit_bytes():
    # Generation-aware: 3/4 of physical VMEM (96 MiB on v5e/v6e, 48 MiB on v7x).
    try:
        cap = int(pltpu.get_tpu_info().vmem_capacity_bytes)
    except Exception:
        cap = 64 * 1024 * 1024       # conservative (v7x-sized) fallback
    return (3 * cap) // 4


def _cparams(semantics):
    return pltpu.CompilerParams(
        dimension_semantics=semantics,
        vmem_limit_bytes=_vmem_limit_bytes(),
    )


def _layer_vmem_bytes(tile_n, tile_k, h_pad):
    # Double-buffered streamed blocks (bf16) + resident weights + f32 acc.
    a_tile = 2 * tile_n * tile_k * 2                       # A row/col tile
    x_tile = 2 * tile_k * h_pad * 2                        # feature (K) tile
    out_tile = 2 * tile_n * h_pad * 2                      # output tile
    resident = 2 * (h_pad * h_pad * 2 + 2 * h_pad * 4)     # W + scale/shift
    acc = tile_n * h_pad * 4                               # f32 accumulator
    return a_tile + x_tile + out_tile + resident + acc


def _pick_tiles(n_pad, h_pad):
    # Largest (tile_n, tile_k) dividing n_pad that fit ~80% of the VMEM budget;
    # keep >= 2 row tiles when possible so the "parallel" row axis can be split
    # across TensorCores (v7x megacore).
    budget = int(0.8 * _vmem_limit_bytes())
    cands = [t for t in (1024, 512, 256, 128) if n_pad % t == 0]
    if not cands:
        cands = [n_pad]
    fallback = (cands[-1], cands[-1])
    for tn in cands:
        if n_pad >= 256 and (n_pad // tn) < 2:
            continue
        for tk in cands:
            if _layer_vmem_bytes(tn, tk, h_pad) <= budget:
                return tn, tk
    return fallback


# ----------------------------- Pallas kernels ------------------------------

def gcn_layer_kernel(a_ref, x_ref, w_ref, scale_ref, shift_ref, o_ref, acc_ref,
                     *, apply_relu):
    # Fused GCNConv layer tile (K-blocked contraction over the node axis):
    #   acc   += A[i, k] @ H[k]                         (MXU, f32 accumulate)
    #   out[i] = act((acc @ W) * scale + shift)         (epilogue at last K)
    k = pl.program_id(1)

    @pl.when(k == 0)
    def _():
        acc_ref[...] = jnp.zeros_like(acc_ref)

    acc_ref[...] += jnp.dot(a_ref[...], x_ref[...],
                            preferred_element_type=jnp.float32)

    @pl.when(k == pl.num_programs(1) - 1)
    def _():
        h = jnp.dot(acc_ref[...].astype(jnp.bfloat16), w_ref[...],
                    preferred_element_type=jnp.float32)
        h = h * scale_ref[...] + shift_ref[...]
        if apply_relu:
            h = jnp.maximum(h, 0.0)
        o_ref[...] = h.astype(o_ref.dtype)


def pool_linear_kernel(p_ref, x_ref, inv_ref, wl_ref, bl_ref, o_ref, acc_ref):
    # global_mean_pool as a tiled reduction (acc += onehot_tile @ X_tile);
    # per-graph 1/count + Linear + bias applied in f32 at the last grid step.
    @pl.when(pl.program_id(0) == 0)
    def _():
        acc_ref[...] = jnp.zeros_like(acc_ref)

    acc_ref[...] += jnp.dot(p_ref[...], x_ref[...],
                            preferred_element_type=jnp.float32)

    @pl.when(pl.program_id(0) == pl.num_programs(0) - 1)
    def _():
        pooled = acc_ref[...] * inv_ref[...]          # exact f32 mean
        o_ref[...] = jnp.dot(pooled, wl_ref[...],
                             preferred_element_type=jnp.float32) + bl_ref[...]


# ------------------------------ wrappers ------------------------------------

def gcn_layer(a_bf16, x_bf16, w_bf16, scale, shift, *, apply_relu,
              tile_n, tile_k):
    n_pad = a_bf16.shape[0]
    h_pad = w_bf16.shape[1]
    cost = pl.CostEstimate(
        flops=2 * n_pad * n_pad * h_pad + 2 * n_pad * h_pad * h_pad,
        transcendentals=0,
        bytes_accessed=2 * n_pad * n_pad + 2 * n_pad * h_pad
        + 2 * h_pad * h_pad + 2 * n_pad * h_pad + 8 * h_pad,
    )
    kernel = functools.partial(gcn_layer_kernel, apply_relu=apply_relu)
    return pl.pallas_call(
        kernel,
        out_shape=jax.ShapeDtypeStruct((n_pad, h_pad), jnp.bfloat16),
        grid=(n_pad // tile_n, n_pad // tile_k),
        in_specs=[
            pl.BlockSpec((tile_n, tile_k), lambda i, k: (i, k)),   # A tile
            pl.BlockSpec((tile_k, h_pad), lambda i, k: (k, 0)),    # H (K) tile
            pl.BlockSpec((h_pad, h_pad), lambda i, k: (0, 0)),     # W
            pl.BlockSpec((1, h_pad), lambda i, k: (0, 0)),         # folded scale
            pl.BlockSpec((1, h_pad), lambda i, k: (0, 0)),         # folded shift
        ],
        out_specs=pl.BlockSpec((tile_n, h_pad), lambda i, k: (i, 0)),
        scratch_shapes=[pltpu.VMEM((tile_n, h_pad), jnp.float32)],
        compiler_params=_cparams(("parallel", "arbitrary")),
        cost_estimate=cost,
    )(a_bf16, x_bf16, w_bf16, scale, shift)


def pool_linear(p_bf16, x_bf16, inv_count, w_lin, b_lin, *, tile_n):
    g_pad, n_pad = p_bf16.shape
    h_pad = x_bf16.shape[1]
    d_pad = w_lin.shape[1]
    cost = pl.CostEstimate(
        flops=2 * g_pad * n_pad * h_pad + 2 * g_pad * h_pad * d_pad,
        transcendentals=0,
        bytes_accessed=2 * g_pad * n_pad + 2 * n_pad * h_pad
        + 4 * h_pad * d_pad + 4 * g_pad * d_pad,
    )
    return pl.pallas_call(
        pool_linear_kernel,
        out_shape=jax.ShapeDtypeStruct((g_pad, d_pad), jnp.float32),
        grid=(n_pad // tile_n,),
        in_specs=[
            pl.BlockSpec((g_pad, tile_n), lambda i: (0, i)),   # one-hot P tile
            pl.BlockSpec((tile_n, h_pad), lambda i: (i, 0)),   # node features
            pl.BlockSpec((g_pad, 1), lambda i: (0, 0)),        # 1/count (f32)
            pl.BlockSpec((h_pad, d_pad), lambda i: (0, 0)),    # linear W (f32)
            pl.BlockSpec((1, d_pad), lambda i: (0, 0)),        # linear b (f32)
        ],
        out_specs=pl.BlockSpec((g_pad, d_pad), lambda i: (0, 0)),
        scratch_shapes=[pltpu.VMEM((g_pad, h_pad), jnp.float32)],
        compiler_params=_cparams(("arbitrary",)),
        cost_estimate=cost,
    )(p_bf16, x_bf16, inv_count, w_lin, b_lin)


# ------------------------------ glue (plain JAX) ----------------------------

def atom_encoder(x_int, emb_tables):
    # OGB AtomEncoder: sum of per-feature embeddings.  x_int: [N, F] int32.
    out = jnp.zeros((x_int.shape[0], emb_tables[0].shape[1]), jnp.float32)
    for f, table in enumerate(emb_tables):
        out = out + jnp.take(table, x_int[:, f], axis=0)
    return out


def build_norm_adj(edge_index, num_nodes):
    # PyG gcn_norm semantics (unweighted): scatter-add multi-edges, replace any
    # existing self-loops by a single weight-1 loop per node (matches
    # add_remaining_self_loops with all-ones weights), then D^-1/2 A D^-1/2.
    src, dst = edge_index[0], edge_index[1]
    a = jnp.zeros((num_nodes, num_nodes), jnp.float32)
    a = a.at[dst, src].add(1.0)
    eye = jnp.eye(num_nodes, dtype=jnp.float32)
    a = a * (1.0 - eye) + eye
    deg = jnp.sum(a, axis=1)
    d_inv_sqrt = jnp.where(deg > 0, jax.lax.rsqrt(deg), 0.0)
    return d_inv_sqrt[:, None] * a * d_inv_sqrt[None, :]


def build_pool_onehot(batch, num_graphs):
    # Exact-in-bf16 0/1 membership matrix; 1/count stays f32 and is applied in
    # the kernel epilogue (no bf16 rounding of the mean weights).
    onehot = (batch[None, :] == jnp.arange(num_graphs)[:, None]).astype(jnp.float32)
    counts = jnp.maximum(jnp.sum(onehot, axis=1, keepdims=True), 1.0)
    return onehot, 1.0 / counts


def fold_bias_bn(b, bn_params):
    # BN(h + b) = (h + b - mean) * gamma/sqrt(var+eps) + beta
    #           = h * scale + shift,  scale = gamma*rsqrt(var+eps),
    #                                 shift = (b - mean)*scale + beta.
    if bn_params is None:
        return jnp.ones_like(b), b
    gamma, beta, mean, var = bn_params
    scale = gamma * jax.lax.rsqrt(var + 1e-5)
    shift = (b - mean) * scale + beta
    return scale, shift


# ------------------------------ model ---------------------------------------

def init_params(key, hidden_dim, output_dim, num_layers,
                num_atom_features, atom_vocab):
    keys = jax.random.split(key, 2 * num_layers + num_atom_features + 2)
    ki = iter(keys)
    params = {}
    params["emb_tables"] = [
        0.1 * jax.random.normal(next(ki), (atom_vocab, hidden_dim), jnp.float32)
        for _ in range(num_atom_features)
    ]
    convs = []
    for _ in range(num_layers):
        scale = 1.0 / jnp.sqrt(jnp.float32(hidden_dim))
        w = scale * jax.random.normal(next(ki), (hidden_dim, hidden_dim), jnp.float32)
        b = jnp.zeros((1, hidden_dim), jnp.float32)
        convs.append((w, b))
    params["convs"] = convs
    # BatchNorm1d defaults (eval mode): gamma=1, beta=0, running stats (0, 1).
    params["bns"] = [
        (jnp.ones((1, hidden_dim), jnp.float32),
         jnp.zeros((1, hidden_dim), jnp.float32),
         jnp.zeros((1, hidden_dim), jnp.float32),
         jnp.ones((1, hidden_dim), jnp.float32))
        for _ in range(num_layers - 1)
    ]
    scale = 1.0 / jnp.sqrt(jnp.float32(hidden_dim))
    params["linear_w"] = scale * jax.random.normal(
        next(ki), (hidden_dim, output_dim), jnp.float32)
    params["linear_b"] = jnp.zeros((1, output_dim), jnp.float32)
    return params


def gcn_graph_forward(params, x_int, edge_index, batch, num_graphs, num_layers):
    num_nodes = x_int.shape[0]
    hidden = params["convs"][0][0].shape[0]
    out_dim = params["linear_w"].shape[1]

    # Lane-dense, tile-friendly padded dims.
    n_pad = _round_up(max(num_nodes, 8), 128)
    h_pad = _round_up(hidden, 128)
    d_pad = _round_up(out_dim, 128)
    g_pad = _round_up(max(num_graphs, 8), 8)
    tile_n, tile_k = _pick_tiles(n_pad, h_pad)

    # Dense normalized adjacency / pooling matrices (plain-JAX glue).
    a_norm = _pad2(build_norm_adj(edge_index, num_nodes),
                   n_pad, n_pad).astype(jnp.bfloat16)
    onehot, inv_count = build_pool_onehot(batch, num_graphs)
    pool_mat = _pad2(onehot, g_pad, n_pad).astype(jnp.bfloat16)
    inv_count = _pad2(inv_count, g_pad, 1)

    # node_encoder (embedding gather stays plain JAX).
    h = _pad2(atom_encoder(x_int, params["emb_tables"]),
              n_pad, h_pad).astype(jnp.bfloat16)

    # gnn_node (return_embeds=True -> last layer raw output); dropout is
    # identity in eval mode.  One fused pallas_call per layer.
    for i in range(num_layers):
        w, b = params["convs"][i]
        bn = params["bns"][i] if i < num_layers - 1 else None
        scale, shift = fold_bias_bn(b, bn)
        w_pad = _pad2(w, h_pad, h_pad).astype(jnp.bfloat16)
        scale_pad = _pad2(scale, 1, h_pad)   # zero-padded channels stay zero
        shift_pad = _pad2(shift, 1, h_pad)
        h = gcn_layer(a_norm, h, w_pad, scale_pad, shift_pad,
                      apply_relu=(i < num_layers - 1),
                      tile_n=tile_n, tile_k=tile_k)

    # global_mean_pool + Linear (fused reduction over N, f32 epilogue).
    w_lin = _pad2(params["linear_w"], h_pad, d_pad)
    b_lin = _pad2(params["linear_b"], 1, d_pad)
    out_pad = pool_linear(pool_mat, h, inv_count, w_lin, b_lin, tile_n=tile_n)
    return out_pad[:num_graphs, :out_dim]


# ------------------------------ main -----------------------------------------

if __name__ == "__main__":
    hidden_dim = 32
    output_dim = 8
    num_layers = 3
    num_atom_features = 4
    atom_vocab = 16

    num_graphs = 4
    nodes_per_graph = 8
    num_nodes = num_graphs * nodes_per_graph
    num_edges = 64

    key = jax.random.PRNGKey(0)
    k_param, k_x, k_src, k_dst = jax.random.split(key, 4)

    params = init_params(k_param, hidden_dim, output_dim, num_layers,
                         num_atom_features, atom_vocab)

    # Integer atom features [N, F].
    x_int = jax.random.randint(k_x, (num_nodes, num_atom_features), 0, atom_vocab,
                               dtype=jnp.int32)

    # Random edges, kept within each graph's node range.
    graph_of_edge = jax.random.randint(k_src, (num_edges,), 0, num_graphs)
    local_src = jax.random.randint(k_src, (num_edges,), 0, nodes_per_graph)
    local_dst = jax.random.randint(k_dst, (num_edges,), 0, nodes_per_graph)
    src = graph_of_edge * nodes_per_graph + local_src
    dst = graph_of_edge * nodes_per_graph + local_dst
    edge_index = jnp.stack([src, dst], axis=0).astype(jnp.int32)

    batch = jnp.repeat(jnp.arange(num_graphs, dtype=jnp.int32), nodes_per_graph)

    out = gcn_graph_forward(params, x_int, edge_index, batch,
                            num_graphs, num_layers)
    out = jax.block_until_ready(out)
    assert out.shape == (num_graphs, output_dim)
    assert bool(jnp.all(jnp.isfinite(out)))
    print("KERNEL_OK")
</pallas_src>

<mosaic_0001>
module attributes {stable_mosaic.version = 11 : i64} {
  func.func @gcn_layer_kernel(%arg0: i32, %arg1: i32, %arg2: memref<128x128xbf16, #tpu.memory_space<vmem>>, %arg3: memref<128x128xbf16, #tpu.memory_space<vmem>>, %arg4: memref<128x128xbf16, #tpu.memory_space<vmem>>, %arg5: memref<1x128xf32, #tpu.memory_space<vmem>>, %arg6: memref<1x128xf32, #tpu.memory_space<vmem>>, %arg7: memref<128x128xbf16, #tpu.memory_space<vmem>>, %arg8: memref<128x128xf32, #tpu.memory_space<vmem>>) attributes {dimension_semantics = [#tpu.dimension_semantics<parallel>, #tpu.dimension_semantics<arbitrary>], iteration_bounds = array<i64: 1, 1>, scalar_prefetch = 0 : i64, scratch_operands = 1 : i64, tpu.core_type = #tpu.core_type<tc>, window_params = [{transform_indices = @transform_0, window_bounds = array<i64: 128, 128>}, {transform_indices = @transform_1, window_bounds = array<i64: 128, 128>}, {pipeline_mode = #tpu.pipeline_mode<synchronous>, transform_indices = @transform_2, window_bounds = array<i64: 128, 128>}, {pipeline_mode = #tpu.pipeline_mode<synchronous>, transform_indices = @transform_3, window_bounds = array<i64: 1, 128>}, {pipeline_mode = #tpu.pipeline_mode<synchronous>, transform_indices = @transform_4, window_bounds = array<i64: 1, 128>}, {transform_indices = @transform_5, window_bounds = array<i64: 128, 128>}]} {
    %c0_i32 = arith.constant 0 : i32
    %0 = arith.cmpi eq, %arg1, %c0_i32 : i32
    %1 = arith.extui %0 : i1 to i32
    %c0_i32_0 = arith.constant 0 : i32
    %2 = arith.cmpi ne, %1, %c0_i32_0 : i32
    scf.if %2 {
      %cst_10 = arith.constant 0.000000e+00 : f32
      %12 = vector.broadcast %cst_10 : f32 to vector<128x128xf32>
      %c0_11 = arith.constant 0 : index
      %c0_12 = arith.constant 0 : index
      %13 = vector.load %arg8[%c0_11, %c0_12] : memref<128x128xf32, #tpu.memory_space<vmem>>, vector<128x128xf32>
      tpu.vector_store %arg8[%c0_11, %c0_12], %12 {strides = array<i32>} : memref<128x128xf32, #tpu.memory_space<vmem>>, vector<128x128xf32>,
    } else {
    }
    %c0 = arith.constant 0 : index
    %c0_1 = arith.constant 0 : index
    %3 = vector.load %arg8[%c0, %c0_1] : memref<128x128xf32, #tpu.memory_space<vmem>>, vector<128x128xf32>
    %c0_2 = arith.constant 0 : index
    %c0_3 = arith.constant 0 : index
    %4 = vector.load %arg2[%c0_2, %c0_3] : memref<128x128xbf16, #tpu.memory_space<vmem>>, vector<128x128xbf16>
    %c0_4 = arith.constant 0 : index
    %c0_5 = arith.constant 0 : index
    %5 = vector.load %arg3[%c0_4, %c0_5] : memref<128x128xbf16, #tpu.memory_space<vmem>>, vector<128x128xbf16>
    %cst = arith.constant dense<0.000000e+00> : vector<128x128xf32>
    %6 = tpu.matmul %4, %5, %cst {dimension_numbers = #tpu.dot_dimension_numbers<[1], [0], [0], [1], [0, 0, 1, 1], [], []>} : vector<128x128xbf16>, vector<128x128xbf16>, vector<128x128xf32> -> vector<128x128xf32>
    %7 = arith.addf %3, %6 : vector<128x128xf32>
    %c0_6 = arith.constant 0 : index
    %c0_7 = arith.constant 0 : index
    %8 = vector.load %arg8[%c0_6, %c0_7] : memref<128x128xf32, #tpu.memory_space<vmem>>, vector<128x128xf32>
    tpu.vector_store %arg8[%c0_6, %c0_7], %7 {strides = array<i32>} : memref<128x128xf32, #tpu.memory_space<vmem>>, vector<128x128xf32>,
    %c0_i32_8 = arith.constant 0 : i32
    %9 = arith.cmpi eq, %arg1, %c0_i32_8 : i32
    %10 = arith.extui %9 : i1 to i32
    %c0_i32_9 = arith.constant 0 : i32
    %11 = arith.cmpi ne, %10, %c0_i32_9 : i32
    scf.if %11 {
      %c0_10 = arith.constant 0 : index
      %c0_11 = arith.constant 0 : index
      %12 = vector.load %arg8[%c0_10, %c0_11] : memref<128x128xf32, #tpu.memory_space<vmem>>, vector<128x128xf32>
      %13 = arith.truncf %12 : vector<128x128xf32> to vector<128x128xbf16>
      %c0_12 = arith.constant 0 : index
      %c0_13 = arith.constant 0 : index
      %14 = vector.load %arg4[%c0_12, %c0_13] : memref<128x128xbf16, #tpu.memory_space<vmem>>, vector<128x128xbf16>
      %cst_14 = arith.constant dense<0.000000e+00> : vector<128x128xf32>
      %15 = tpu.matmul %13, %14, %cst_14 {dimension_numbers = #tpu.dot_dimension_numbers<[1], [0], [0], [1], [0, 0, 1, 1], [], []>} : vector<128x128xbf16>, vector<128x128xbf16>, vector<128x128xf32> -> vector<128x128xf32>
      %c0_15 = arith.constant 0 : index
      %c0_16 = arith.constant 0 : index
      %16 = vector.load %arg5[%c0_15, %c0_16] : memref<1x128xf32, #tpu.memory_space<vmem>>, vector<1x128xf32>
      %17 = vector.broadcast %16 : vector<1x128xf32> to vector<128x128xf32>
      %18 = arith.mulf %15, %17 : vector<128x128xf32>
      %c0_17 = arith.constant 0 : index
      %c0_18 = arith.constant 0 : index
      %19 = vector.load %arg6[%c0_17, %c0_18] : memref<1x128xf32, #tpu.memory_space<vmem>>, vector<1x128xf32>
      %20 = vector.broadcast %19 : vector<1x128xf32> to vector<128x128xf32>
      %21 = arith.addf %18, %20 : vector<128x128xf32>
      %cst_19 = arith.constant 0.000000e+00 : f32
      %22 = vector.broadcast %cst_19 : f32 to vector<128x128xf32>
      %23 = arith.maximumf %21, %22 : vector<128x128xf32>
      %24 = arith.truncf %23 : vector<128x128xf32> to vector<128x128xbf16>
      %c0_20 = arith.constant 0 : index
      %c0_21 = arith.constant 0 : index
      %25 = vector.load %arg7[%c0_20, %c0_21] : memref<128x128xbf16, #tpu.memory_space<vmem>>, vector<128x128xbf16>
      tpu.vector_store %arg7[%c0_20, %c0_21], %24 {strides = array<i32>} : memref<128x128xbf16, #tpu.memory_space<vmem>>, vector<128x128xbf16>,
    } else {
    }
    return
  }
  func.func @transform_0(%arg0: i32, %arg1: i32) -> (i32, i32) {
    %c0_i32 = arith.constant 0 : i32
    return %arg0, %arg1 : i32, i32
  }
  func.func @transform_1(%arg0: i32, %arg1: i32) -> (i32, i32) {
    %c0_i32 = arith.constant 0 : i32
    %c0_i32_0 = arith.constant 0 : i32
    return %arg1, %c0_i32 : i32, i32
  }
  func.func @transform_2(%arg0: i32, %arg1: i32) -> (i32, i32) {
    %c0_i32 = arith.constant 0 : i32
    %c0_i32_0 = arith.constant 0 : i32
    %c0_i32_1 = arith.constant 0 : i32
    return %c0_i32, %c0_i32_0 : i32, i32
  }
  func.func @transform_3(%arg0: i32, %arg1: i32) -> (i32, i32) {
    %c0_i32 = arith.constant 0 : i32
    %c0_i32_0 = arith.constant 0 : i32
    %c0_i32_1 = arith.constant 0 : i32
    return %c0_i32, %c0_i32_0 : i32, i32
  }
  func.func @transform_4(%arg0: i32, %arg1: i32) -> (i32, i32) {
    %c0_i32 = arith.constant 0 : i32
    %c0_i32_0 = arith.constant 0 : i32
    %c0_i32_1 = arith.constant 0 : i32
    return %c0_i32, %c0_i32_0 : i32, i32
  }
  func.func @transform_5(%arg0: i32, %arg1: i32) -> (i32, i32) {
    %c0_i32 = arith.constant 0 : i32
    %c0_i32_0 = arith.constant 0 : i32
    return %arg0, %c0_i32 : i32, i32
  }
}

</mosaic_0001>

<bundles_post_ra>
// kernel: tpu_custom_call.1
= control target key start
LH: loop header
LB: loop body
LE: loop exit
PB: predicated region body
PF: predicated region fallthrough
CT: control target
= control target key end

     0   :  { %10 = vsyncpa [#allocation4], 0  ;;  %s1174_s0 = inlined_call_operand.hbm [shape: bf16[128,128], index: 0, kind: input, shape index: {}]   ;;  %s1175_s1 = inlined_call_operand.hbm [shape: bf16[128,128], index: 1, kind: input, shape index: {}]   ;;  %s1176_s2 = inlined_call_operand.hbm [shape: bf16[128,128], index: 2, kind: input, shape index: {}]   ;;  %s1177_s3 = inlined_call_operand.vmem [shape: f32[1,128], index: 3, kind: input, shape index: {}]   ;;  %s1178_s4 = inlined_call_operand.vmem [shape: f32[1,128], index: 4, kind: input, shape index: {}]   ;;  %s1179_s5 = inlined_call_operand.hbm [shape: bf16[128,128], index: 5, kind: output, shape index: {}]  }
   0x1   :  { %11 = vsyncpa [#allocation7], 0 }
   0x2   :  { %12 = vsyncpa [#allocation5], 0  ;;  %s1029_s18 = smov [#allocation6]   ;;  %s1030_s20 = smov [#allocation3]  }
   0x3   :  { %s30_s19 = sshll.u32 %s1029_s18, 4  ;;  %s18_s21 = sshll.u32 %s1030_s20, 4  ;;  %s31_s19 = int_to_ptr.vmem [resolvable:$true] %s30_s19  ;;  %s1065_s21 = int_to_ptr.vmem [resolvable:$true] %s18_s21 }
   0x4   :  { %s935_s24 = scalar_lea.hbm %s1175_s1, 1024 }
   0x5   :  { %p936_p0 = scmp.ne.s32.totalorder %s1175_s1, %s935_s24  ;;  %p939_p1 = scmp.lt.u32.totalorder %s935_s24, %s1175_s1 }
   0x7   :  { %p941_p2 = pnand %p939_p1, %p936_p0 }
   0x9   :  { %944 = shalt.err (!%p941_p2)
}
   0xa   :  { %s945_s29 = scalar_lea.vmem %s31_s19, 1024  ;;  %p950_p4 = scmp.lt.s32.totalorder %s31_s19, %s31_s19 }
   0xb   :  { %p946_p3 = scmp.ne.s32.totalorder %s31_s19, %s945_s29  ;;  %p951_p5 = scmp.lt.s32.totalorder %s945_s29, %s945_s29 }
   0xd   :  { %p952_p6 = por %p951_p5, %p950_p4 }
   0xf   :  { %p953_p7 = pnand %p952_p6, %p946_p3 }
  0x11   :  { %956 = shalt.err (!%p953_p7)
}
  0x12   :  { %s1031_s30 = smov 64   ;;  %s1032_s6 = smov 4  }
  0x13   :  { %36 = dma.hbm_to_vmem [thread:$0]  %s1175_s1, 1024, %s31_s19, [#allocation7], %s1031_s30, %s1031_s30, %s1032_s6  }
  0x14   :  { %s957_s11 = scalar_lea.hbm %s1174_s0, 1024 }
  0x15   :  { %p958_p8 = scmp.ne.s32.totalorder %s1174_s0, %s957_s11  ;;  %p961_p9 = scmp.lt.u32.totalorder %s957_s11, %s1174_s0 }
  0x17   :  { %p963_p10 = pnand %p961_p9, %p958_p8 }
  0x19   :  { %966 = shalt.err (!%p963_p10)
}
  0x1a   :  { %s967_s16 = scalar_lea.vmem %s1065_s21, 1024  ;;  %p972_p12 = scmp.lt.s32.totalorder %s1065_s21, %s1065_s21 }
  0x1b   :  { %p968_p11 = scmp.ne.s32.totalorder %s1065_s21, %s967_s16  ;;  %p973_p13 = scmp.lt.s32.totalorder %s967_s16, %s967_s16 }
  0x1d   :  { %p974_p0 = por %p973_p13, %p972_p12 }
  0x1f   :  { %p975_p1 = pnand %p974_p0, %p968_p11 }
  0x21   :  { %978 = shalt.err (!%p975_p1)
}
  0x22   :  { %24 = dma.hbm_to_vmem [thread:$0]  %s1174_s0, 1024, %s1065_s21, [#allocation4], %s1031_s30, %s1031_s30, %s1032_s6  }
  0x23   :  { %s1033_s18 = smov [#allocation8]   ;;  %s979_s23 = scalar_lea.hbm %s1176_s2, 1024 }
  0x24   :  { %s42_s19 = sshll.u32 %s1033_s18, 4  ;;  %p980_p2 = scmp.ne.s32.totalorder %s1176_s2, %s979_s23  ;;  %s43_s19 = int_to_ptr.vmem [resolvable:$true] %s42_s19 }
  0x25   :  { %p983_p3 = scmp.lt.u32.totalorder %s979_s23, %s1176_s2 }
  0x27   :  { %p985_p4 = pnand %p983_p3, %p980_p2 }
  0x29   :  { %988 = shalt.err (!%p985_p4)
}
  0x2a   :  { %s989_s28 = scalar_lea.vmem %s43_s19, 1024  ;;  %p994_p6 = scmp.lt.s32.totalorder %s43_s19, %s43_s19 }
  0x2b   :  { %p990_p5 = scmp.ne.s32.totalorder %s43_s19, %s989_s28  ;;  %p995_p7 = scmp.lt.s32.totalorder %s989_s28, %s989_s28 }
  0x2d   :  { %p996_p8 = por %p995_p7, %p994_p6 }
  0x2f   :  { %p997_p9 = pnand %p996_p8, %p990_p5 }
  0x31   :  { %1000 = shalt.err (!%p997_p9)
}
  0x32   :  { %48 = dma.hbm_to_vmem [thread:$0]  %s1176_s2, 1024, %s43_s19, [#allocation7], %s1031_s30, %s1031_s30, %s1032_s6  }
  0x33   :  { %1023 = dma.done.wait [#allocation4], 1024  }
  0x34   :  { %1024 = vsyncadd [#allocation4], 4294966272 }
  0x35   :  { %1025 = dma.done.wait [#allocation7], 2048  }
  0x36   :  { %1026 = vsyncadd [#allocation7], 4294965248  ;;  %v911_v0 = vld [vmem:[#allocation6] sm:$0xff]   ;;  %v912_v1 = vld [vmem:[#allocation6 + $0x8] sm:$0xff]  }
  0x37   :  { %841 = vmatprep.subr.bf16.mxu0 %v911_v0  ;;  %v913_v2 = vld [vmem:[#allocation6 + $0x10] sm:$0xff]   ;;  %v914_v3 = vld [vmem:[#allocation6 + $0x18] sm:$0xff]   ;;  %v919_v4 = vld [vmem:[#allocation3] sm:$0xff]  }
  0x38   :  { %842 = vmatpush3.bf16.msra.mxu0 %v911_v0  ;;  %857 = vmatprep.mubr.bf16.mxu0 %v919_v4  ;;  %v915_v5 = vld [vmem:[#allocation6 + $0x20] sm:$0xff]   ;;  %v916_v6 = vld [vmem:[#allocation6 + $0x28] sm:$0xff]   ;;  %v917_v9 = vld [vmem:[#allocation6 + $0x30] sm:$0xff]  }
  0x39   :  { %843 = vmatprep.subr.bf16.mxu0 %v912_v1  ;;  %v927_v7 = vld [vmem:[#allocation8] sm:$0xff]   ;;  %v928_v8 = vld [vmem:[#allocation8 + $0x8] sm:$0xff]   ;;  %v929_v10 = vld [vmem:[#allocation8 + $0x10] sm:$0xff]  }
  0x3a   :  { %873 = vmatprep.subr.bf16.mxu1 %v927_v7  ;;  %v918_v11 = vld [vmem:[#allocation6 + $0x38] sm:$0xff]   ;;  %v931_v13 = vld [vmem:[#allocation8 + $0x20] sm:$0xff]   ;;  %v920_v14 = vld [vmem:[#allocation3 + $0x8] sm:$0xff]  }
  0x3b   :  { %874 = vmatpush3.bf16.msra.mxu1 %v927_v7  ;;  %v930_v12 = vld [vmem:[#allocation8 + $0x18] sm:$0xff]   ;;  %v921_v15 = vld [vmem:[#allocation3 + $0x10] sm:$0xff]   ;;  %v932_v16 = vld [vmem:[#allocation8 + $0x28] sm:$0xff]  }
  0x3c   :  { %844 = vmatpush3.bf16.msra.mxu0 %v912_v1  ;;  %875 = vmatprep.subr.bf16.mxu1 %v928_v8  ;;  %v933_v17 = vld [vmem:[#allocation8 + $0x30] sm:$0xff]   ;;  %v922_v18 = vld [vmem:[#allocation3 + $0x18] sm:$0xff]   ;;  %v923_v19 = vld [vmem:[#allocation3 + $0x20] sm:$0xff]  }
  0x3d   :  { %845 = vmatprep.subr.bf16.mxu0 %v913_v2  ;;  %v924_v20 = vld [vmem:[#allocation3 + $0x28] sm:$0xff]   ;;  %v925_v21 = vld [vmem:[#allocation3 + $0x30] sm:$0xff]   ;;  %v926_v22 = vld [vmem:[#allocation3 + $0x38] sm:$0xff]  }
  0x3e   :  { %v934_v23 = vld [vmem:[#allocation8 + $0x38] sm:$0xff]   ;;  %v1120_v48 = vld [vmem:[%s1177_s3] ss:$0 sm:$0xff]  ;;  %s1034_s3 = smov [#allocation9]  }
  0x3f   :  { %876 = vmatpush3.bf16.msra.mxu1 %v928_v8  ;;  %v1125_v50 = vld [vmem:[%s1178_s4] ss:$0 sm:$0xff]  ;;  %s691_s4 = sshll.u32 %s1034_s3, 4  ;;  %s692_s4 = int_to_ptr.vmem [resolvable:$true] %s691_s4 }
  0x40   :  { %846 = vmatpush3.bf16.msra.mxu0 %v913_v2  ;;  %877 = vmatprep.subr.bf16.mxu1 %v929_v10  ;;  %s1001_s9 = scalar_lea.vmem %s692_s4, 1024  ;;  %p1006_p11 = scmp.lt.s32.totalorder %s692_s4, %s692_s4 }
  0x41   :  { %847 = vmatprep.subr.bf16.mxu0 %v914_v3  ;;  %p1002_p10 = scmp.ne.s32.totalorder %s692_s4, %s1001_s9  ;;  %p1007_p12 = scmp.lt.s32.totalorder %s1001_s9, %s1001_s9 }
  0x43   :  { %878 = vmatpush3.bf16.msra.mxu1 %v929_v10  ;;  %p1008_p13 = por %p1007_p12, %p1006_p11 }
  0x44   :  { %848 = vmatpush3.bf16.msra.mxu0 %v914_v3  ;;  %879 = vmatprep.subr.bf16.mxu1 %v930_v12 }
  0x45   :  { %849 = vmatprep.subr.bf16.mxu0 %v915_v5  ;;  %p1009_p0 = pnand %p1008_p13, %p1002_p10 }
  0x47   :  { %880 = vmatpush3.bf16.msra.mxu1 %v930_v12 }
  0x48   :  { %850 = vmatpush3.bf16.msra.mxu0 %v915_v5  ;;  %881 = vmatprep.subr.bf16.mxu1 %v931_v13 }
  0x49   :  { %851 = vmatprep.subr.bf16.mxu0 %v916_v6 }
  0x4b   :  { %882 = vmatpush3.bf16.msra.mxu1 %v931_v13 }
  0x4c   :  { %852 = vmatpush3.bf16.msra.mxu0 %v916_v6  ;;  %883 = vmatprep.subr.bf16.mxu1 %v932_v16 }
  0x4d   :  { %853 = vmatprep.subr.bf16.mxu0 %v917_v9 }
  0x4f   :  { %884 = vmatpush3.bf16.msra.mxu1 %v932_v16 }
  0x50   :  { %854 = vmatpush3.bf16.msra.mxu0 %v917_v9  ;;  %885 = vmatprep.subr.bf16.mxu1 %v933_v17 }
  0x51   :  { %855 = vmatprep.subr.bf16.mxu0 %v918_v11 }
  0x53   :  { %886 = vmatpush3.bf16.msra.mxu1 %v933_v17 }
  0x54   :  { %856 = vmatpush3.bf16.msra.mxu0 %v918_v11  ;;  %887 = vmatprep.subr.bf16.mxu1 %v934_v23 }
  0x57   :  { %858 = vmatmul.mubr.bf16.vlgmr.msra.gmra.mrb[0].mxu0 %v920_v14  ;;  %888 = vmatpush3.bf16.msra.mxu1 %v934_v23 }
  0x58   :  { %861 = vmatprep.mubr.bf16.mxu0 %v921_v15 }
  0x5f   :  { %862 = vmatmul.mubr.bf16.gmra.mrb[4].mxu0 %v922_v18 }
  0x60   :  { %865 = vmatprep.mubr.bf16.mxu0 %v923_v19 }
  0x67   :  { %866 = vmatmul.mubr.bf16.gmra.mrb[8].mxu0 %v924_v20 }
  0x68   :  { %869 = vmatprep.mubr.bf16.mxu0 %v925_v21 }
  0x6f   :  { %870 = vmatmul.mubr.bf16.gmra.mrb[12].mxu0 %v926_v22 }
 0x12a   :  { %v859_v24 = vpop.f32.mrb[0].mxu0 }
 0x12b   :  { %v261_v25 = vpop.f32.mrb[1].mxu0 }
 0x12c   :  { %v860_v26 = vpop.f32.mrb[2].mxu0 }
 0x12d   :  { %v376_v27 = vpack.c.bf16 %v860_v26, %v859_v24  ;;  %v264_v28 = vpop.f32.mrb[3].mxu0 }
 0x12e   :  { %v375_v29 = vpack.c.bf16 %v264_v28, %v261_v25 }
 0x130   :  { %889 = vmatprep.mubr.bf16.mxu1 %v375_v29 }
 0x131   :  { %890 = vmatmul.mubr.bf16.vlgmr.msra.gmra.mrb[0].mxu1 %v376_v27 }
 0x132   :  { %v863_v30 = vpop.f32.mrb[4].mxu0 }
 0x133   :  { %v277_v31 = vpop.f32.mrb[5].mxu0 }
 0x134   :  { %v864_v32 = vpop.f32.mrb[6].mxu0 }
 0x135   :  { %v378_v33 = vpack.c.bf16 %v864_v32, %v863_v30  ;;  %v280_v34 = vpop.f32.mrb[7].mxu0 }
 0x136   :  { %v377_v35 = vpack.c.bf16 %v280_v34, %v277_v31 }
 0x138   :  { %893 = vmatprep.mubr.bf16.mxu1 %v377_v35 }
 0x139   :  { %894 = vmatmul.mubr.bf16.gmra.mrb[4].mxu1 %v378_v33 }
 0x13a   :  { %v867_v36 = vpop.f32.mrb[8].mxu0 }
 0x13b   :  { %v293_v37 = vpop.f32.mrb[9].mxu0 }
 0x13c   :  { %v868_v38 = vpop.f32.mrb[10].mxu0 }
 0x13d   :  { %v380_v39 = vpack.c.bf16 %v868_v38, %v867_v36  ;;  %v296_v40 = vpop.f32.mrb[11].mxu0 }
 0x13e   :  { %v379_v41 = vpack.c.bf16 %v296_v40, %v293_v37 }
 0x140   :  { %897 = vmatprep.mubr.bf16.mxu1 %v379_v41 }
 0x141   :  { %898 = vmatmul.mubr.bf16.gmra.mrb[8].mxu1 %v380_v39 }
 0x142   :  { %v871_v42 = vpop.f32.mrb[12].mxu0 }
 0x143   :  { %v309_v43 = vpop.f32.mrb[13].mxu0 }
 0x144   :  { %v872_v44 = vpop.f32.mrb[14].mxu0 }
 0x145   :  { %v382_v45 = vpack.c.bf16 %v872_v44, %v871_v42  ;;  %v312_v46 = vpop.f32.mrb[15].mxu0 }
 0x146   :  { %v381_v47 = vpack.c.bf16 %v312_v46, %v309_v43 }
 0x148   :  { %901 = vmatprep.mubr.bf16.mxu1 %v381_v47 }
 0x149   :  { %902 = vmatmul.mubr.bf16.gmra.mrb[12].mxu1 %v382_v45 }
 0x204   :  { %v891_v49 = vpop.f32.mrb[0].mxu1 }
 0x205   :  { %v553_v51 = vmul.f32 %v891_v49, %v1120_v48  ;;  %v481_v52 = vpop.f32.mrb[1].mxu1 }
 0x206   :  { %v551_v53 = vmul.f32 %v1120_v48, %v481_v52  ;;  %v892_v54 = vpop.f32.mrb[2].mxu1 }
 0x207   :  { %v576_v55 = vadd.f32 %v1125_v50, %v553_v51  ;;  %v554_v56 = vmul.f32 %v892_v54, %v1120_v48  ;;  %v484_v57 = vpop.f32.mrb[3].mxu1 }
 0x208   :  { %v574_v58 = vadd.f32 %v1125_v50, %v551_v53  ;;  %v552_v59 = vmul.f32 %v1120_v48, %v484_v57 }
 0x209   :  { %v577_v60 = vadd.f32 %v1125_v50, %v554_v56  ;;  %v592_v62 = vmax.f32 %v576_v55, 0.0 }
 0x20a   :  { %v575_v61 = vadd.f32 %v1125_v50, %v552_v59  ;;  %v590_v0 = vmax.f32 %v574_v58, 0.0 }
 0x20b   :  { %v593_v63 = vmax.f32 %v577_v60, 0.0 }
 0x20c   :  { %v591_v1 = vmax.f32 %v575_v61, 0.0  ;;  %v895_v2 = vpop.f32.mrb[4].mxu1 }
 0x20d   :  { %v770_v3 = vpack.c.bf16 %v593_v63, %v592_v62  ;;  %v557_v4 = vmul.f32 %v895_v2, %v1120_v48  ;;  %v497_v5 = vpop.f32.mrb[5].mxu1 }
 0x20e   :  { %v765_v6 = vpack.c.bf16 %v591_v1, %v590_v0  ;;  %v555_v7 = vmul.f32 %v1120_v48, %v497_v5  ;;  %v896_v8 = vpop.f32.mrb[6].mxu1 }
 0x20f   :  { %802 = vst [vmem:[#allocation9 + $0x8] sm:$0xff] %v770_v3   ;;  %v580_v9 = vadd.f32 %v1125_v50, %v557_v4  ;;  %v558_v10 = vmul.f32 %v896_v8, %v1120_v48  ;;  %v500_v11 = vpop.f32.mrb[7].mxu1 }
 0x210   :  { %766 = vst [vmem:[#allocation9] sm:$0xff] %v765_v6   ;;  %v578_v12 = vadd.f32 %v1125_v50, %v555_v7  ;;  %v556_v13 = vmul.f32 %v1120_v48, %v500_v11 }
 0x211   :  { %v581_v14 = vadd.f32 %v1125_v50, %v558_v10  ;;  %v596_v16 = vmax.f32 %v580_v9, 0.0 }
 0x212   :  { %v579_v15 = vadd.f32 %v1125_v50, %v556_v13  ;;  %v594_v18 = vmax.f32 %v578_v12, 0.0 }
 0x213   :  { %v597_v17 = vmax.f32 %v581_v14, 0.0 }
 0x214   :  { %v595_v19 = vmax.f32 %v579_v15, 0.0  ;;  %v899_v20 = vpop.f32.mrb[8].mxu1 }
 0x215   :  { %v780_v21 = vpack.c.bf16 %v597_v17, %v596_v16  ;;  %v561_v22 = vmul.f32 %v899_v20, %v1120_v48  ;;  %v513_v23 = vpop.f32.mrb[9].mxu1 }
 0x216   :  { %v775_v24 = vpack.c.bf16 %v595_v19, %v594_v18  ;;  %v559_v25 = vmul.f32 %v1120_v48, %v513_v23  ;;  %v900_v26 = vpop.f32.mrb[10].mxu1 }
 0x217   :  { %804 = vst [vmem:[#allocation9 + $0x18] sm:$0xff] %v780_v21   ;;  %v584_v27 = vadd.f32 %v1125_v50, %v561_v22  ;;  %v562_v28 = vmul.f32 %v900_v26, %v1120_v48  ;;  %v516_v29 = vpop.f32.mrb[11].mxu1 }
 0x218   :  { %803 = vst [vmem:[#allocation9 + $0x10] sm:$0xff] %v775_v24   ;;  %v582_v30 = vadd.f32 %v1125_v50, %v559_v25  ;;  %v560_v31 = vmul.f32 %v1120_v48, %v516_v29 }
 0x219   :  { %v585_v32 = vadd.f32 %v1125_v50, %v562_v28  ;;  %v600_v34 = vmax.f32 %v584_v27, 0.0 }
 0x21a   :  { %v583_v33 = vadd.f32 %v1125_v50, %v560_v31  ;;  %v598_v36 = vmax.f32 %v582_v30, 0.0 }
 0x21b   :  { %v601_v35 = vmax.f32 %v585_v32, 0.0 }
 0x21c   :  { %v599_v37 = vmax.f32 %v583_v33, 0.0  ;;  %v903_v38 = vpop.f32.mrb[12].mxu1 }
 0x21d   :  { %v790_v39 = vpack.c.bf16 %v601_v35, %v600_v34  ;;  %v565_v40 = vmul.f32 %v903_v38, %v1120_v48  ;;  %v529_v41 = vpop.f32.mrb[13].mxu1 }
 0x21e   :  { %v785_v42 = vpack.c.bf16 %v599_v37, %v598_v36  ;;  %v563_v43 = vmul.f32 %v1120_v48, %v529_v41  ;;  %v904_v44 = vpop.f32.mrb[14].mxu1 }
 0x21f   :  { %806 = vst [vmem:[#allocation9 + $0x28] sm:$0xff] %v790_v39   ;;  %v588_v45 = vadd.f32 %v1125_v50, %v565_v40  ;;  %v566_v46 = vmul.f32 %v904_v44, %v1120_v48  ;;  %v532_v47 = vpop.f32.mrb[15].mxu1 }
 0x220   :  { %805 = vst [vmem:[#allocation9 + $0x20] sm:$0xff] %v785_v42   ;;  %v586_v49 = vadd.f32 %v1125_v50, %v563_v43  ;;  %v564_v51 = vmul.f32 %v1120_v48, %v532_v47 }
 0x221   :  { %v589_v52 = vadd.f32 %v1125_v50, %v566_v46  ;;  %v604_v54 = vmax.f32 %v588_v45, 0.0 }
 0x222   :  { %v587_v53 = vadd.f32 %v1125_v50, %v564_v51  ;;  %v602_v56 = vmax.f32 %v586_v49, 0.0 }
 0x223   :  { %v605_v55 = vmax.f32 %v589_v52, 0.0 }
 0x224   :  { %v603_v57 = vmax.f32 %v587_v53, 0.0 }
 0x225   :  { %v800_v58 = vpack.c.bf16 %v605_v55, %v604_v54 }
 0x226   :  { %v795_v59 = vpack.c.bf16 %v603_v57, %v602_v56 }
 0x227   :  { %808 = vst [vmem:[#allocation9 + $0x38] sm:$0xff] %v800_v58  }
 0x228   :  { %807 = vst [vmem:[#allocation9 + $0x30] sm:$0xff] %v795_v59  }
 0x229   :  { %1012 = shalt.err (!%p1009_p0)
}
 0x22a   :  { %s1013_s12 = scalar_lea.hbm %s1179_s5, 1024 }
 0x22b   :  { %p1014_p1 = scmp.ne.s32.totalorder %s1179_s5, %s1013_s12  ;;  %p1017_p2 = scmp.lt.u32.totalorder %s1013_s12, %s1179_s5 }
 0x22d   :  { %p1019_p3 = pnand %p1017_p2, %p1014_p1 }
 0x22f   :  { %1022 = shalt.err (!%p1019_p3)
}
 0x230   :  { %697 = dma.vmem_to_hbm [thread:$0]  %s692_s4, 1024, %s1179_s5, [#allocation5], %s1031_s30, %s1031_s30, %s1032_s6  }
 0x231   :  { %1027 = dma.done.wait [#allocation5], 1024  }
 0x232   :  { %1028 = vsyncadd [#allocation5], 4294966272 }
 0x233   :  { %701 = vsyncpa [#allocation4], 1 }
 0x234   :  { %702 = vsyncpa [#allocation7], 1 }
 0x235   :  { %703 = vsyncpa [#allocation5], 1 }

</bundles_post_ra>
